<compile_context>
chip_gen: v7x
topology: tpu7x:2x2x1
jax: 0.10.0
libtpu: 0.0.40
codegen_flags: <defaults>
</compile_context>

<pallas_src>
import functools

import jax
import jax.numpy as jnp
from jax.experimental import pallas as pl
from jax.experimental.pallas import tpu as pltpu


# ----------------------------- Pallas kernel --------------------------------
def _make_qvalue_kernel(num_hidden):
    """Kernel for a ReLU MLP with `num_hidden` hidden layers + scalar Q head.

    Ref order: catT, (w_l, b_l) * num_hidden, w_head, b_head, out
      catT   : [in_dim, TB]   bf16  (batch tile on lanes)
      w_l    : [h_l, prev]    bf16  (PyTorch [out, in] layout, unchanged)
      b_l    : [h_l, 1]       f32
      w_head : [1, h_last]    bf16  (row vector -> MXU head matmul)
      b_head : [1, 1]         f32
      out    : [1, TB]        f32   (lane-dense Q row)
    """

    def kernel(*refs):
        act = refs[0][...]                                   # bf16 [in, TB]
        for l in range(num_hidden):
            w = refs[1 + 2 * l][...]                         # bf16 [h, prev]
            b = refs[2 + 2 * l][...]                         # f32  [h, 1]
            z = jnp.dot(w, act, preferred_element_type=jnp.float32) + b
            # Fused ReLU + bf16 downcast: one VALU pass, bf16-carried act.
            act = jnp.maximum(z, 0.0).astype(jnp.bfloat16)   # bf16 [h, TB]
        w_head = refs[1 + 2 * num_hidden][...]               # bf16 [1, h]
        b_head = refs[2 + 2 * num_hidden][...]               # f32  [1, 1]
        out_ref = refs[3 + 2 * num_hidden]
        # Q head on the (otherwise idle) MXU; output already lane-major.
        q = jnp.dot(w_head, act, preferred_element_type=jnp.float32) + b_head
        out_ref[...] = q.astype(out_ref.dtype)               # [1, TB]

    return kernel


# ------------------------------- wrapper -------------------------------------
def _round_up(x, m):
    return ((x + m - 1) // m) * m


@functools.partial(jax.jit, static_argnames=("tile_b",))
def qvalue_forward(x, a, prepped, tile_b=8192):
    """x: [B, state_dim] f32, a: [B, action_dim] f32.
    `prepped` comes from prepare_params() (one-time weight prep, hoisted out
    of the per-call path).  `tile_b` is the maximum batch tile; it is capped
    so the grid has >= 2 steps when possible (v7x megacore)."""
    B = x.shape[0]
    in_dim = x.shape[1] + a.shape[1]
    num_hidden = (len(prepped) - 2) // 2

    # Large tiles amortize the ~0.35us per-step overhead; cap so there are at
    # least two grid steps (keeps both v7x TensorCores fed); lane-align to 128.
    eff_tile = max(128, min(int(tile_b), _round_up(pl.cdiv(B, 2), 128)))
    num_tiles = pl.cdiv(B, eff_tile)
    B_pad = num_tiles * eff_tile

    # Fused cat + transpose + bf16 cast (+ pad): kernel sees one lane-dense
    # [in_dim, B_pad] slab.
    catT = jnp.concatenate([x, a], axis=1).T.astype(jnp.bfloat16)
    if B_pad != B:
        catT = jnp.pad(catT, ((0, 0), (0, B_pad - B)))

    in_specs = [pl.BlockSpec((in_dim, eff_tile), lambda i: (0, i))]
    # Weights/biases are tiny: constant index_map keeps them VMEM-resident
    # (Pallas skips the re-DMA when the block index is unchanged).
    in_specs += [pl.BlockSpec(p.shape, lambda i: (0, 0)) for p in prepped]
    out_spec = pl.BlockSpec((1, eff_tile), lambda i: (0, i))

    flops = 2 * B_pad * sum(int(prepped[2 * l].size) for l in range(num_hidden))
    flops += 2 * B_pad * int(prepped[2 * num_hidden].size)
    bytes_accessed = int(catT.size) * 2 + B_pad * 4
    bytes_accessed += sum(int(p.size) * p.dtype.itemsize for p in prepped)

    out = pl.pallas_call(
        _make_qvalue_kernel(num_hidden),
        out_shape=jax.ShapeDtypeStruct((1, B_pad), jnp.float32),
        grid=(num_tiles,),
        in_specs=in_specs,
        out_specs=out_spec,
        compiler_params=pltpu.CompilerParams(
            dimension_semantics=("parallel",)),   # megacore-shard the batch axis
        cost_estimate=pl.CostEstimate(
            flops=flops, transcendentals=0, bytes_accessed=bytes_accessed),
    )(catT, *prepped)

    return out[0, :B].reshape(B, 1)


def prepare_params(params):
    """One-time conversion of PyTorch-layout params ([out, in] weights, [out]
    biases) into the kernel layout. Call once; reuse across forward calls."""
    *hidden, (w_head, b_head) = params
    prepped = []
    for w, b in hidden:
        prepped.append(jnp.asarray(w, jnp.bfloat16))                   # [out, in]
        prepped.append(jnp.asarray(b, jnp.float32).reshape(-1, 1))     # [out, 1]
    prepped.append(jnp.asarray(w_head, jnp.bfloat16).reshape(1, -1))   # [1, h]
    prepped.append(jnp.asarray(b_head, jnp.float32).reshape(1, 1))     # [1, 1]
    return tuple(prepped)


# --------------------------- parameter init ----------------------------------
def orthogonal_init(key, out_dim, in_dim, gain):
    """Orthogonal init matching torch.nn.init.orthogonal_ semantics."""
    flat = jax.random.normal(key, (out_dim, in_dim), dtype=jnp.float32)
    a = flat.T if out_dim < in_dim else flat
    q, r = jnp.linalg.qr(a)
    q = q * jnp.sign(jnp.diag(r))[None, :]
    if out_dim < in_dim:
        q = q.T
    return (gain * q).astype(jnp.float32)


def make_params(state_dim, action_dim, net_arch, key):
    """Matches QValueNetContinuous.__init__: orthogonal(sqrt(2)) weights and
    zero biases for every layer (the spec's _layer_init default, incl. head).
    Returns a list of (weight [out,in], bias [out]) per layer."""
    dims = list(net_arch) + [1]
    in_dim = state_dim + action_dim
    params = []
    for out_dim, k in zip(dims, jax.random.split(key, len(dims))):
        w = orthogonal_init(k, out_dim, in_dim, float(jnp.sqrt(2.0)))
        b = jnp.zeros((out_dim,), jnp.float32)
        params.append((w, b))
        in_dim = out_dim
    return params


# ------------------------------- reference -----------------------------------
def qvalue_reference(x, a, params):
    h = jnp.concatenate([x, a], axis=1)
    for i, (w, b) in enumerate(params):
        h = h @ w.T + b
        if i < len(params) - 1:
            h = jnp.maximum(h, 0.0)
    return h


if __name__ == "__main__":
    state_dim, action_dim = 8, 4
    net_arch = (32, 32)

    key = jax.random.PRNGKey(0)
    kx, ka, kp = jax.random.split(key, 3)
    params = make_params(state_dim, action_dim, net_arch, kp)
    prepped = prepare_params(params)   # one-time weight prep (hoisted)

    # Small demo batch (single tile after the >=128 lane-alignment floor).
    B = 8
    x = jax.random.normal(kx, (B, state_dim), dtype=jnp.float32)
    a = jax.random.normal(ka, (B, action_dim), dtype=jnp.float32)
    out = jax.block_until_ready(qvalue_forward(x, a, prepped))
    ref = qvalue_reference(x, a, params)
    assert out.shape == (B, 1), out.shape
    # Tolerance accounts for bf16 MXU inputs / bf16-carried activations
    # (f32 accumulation everywhere).
    assert jnp.allclose(out, ref, atol=1.5e-1, rtol=5e-2), (out, ref)

    # Multi-tile + ragged batch: with the >=2-tile cap this becomes two 256-lane
    # tiles (exercises the grid, megacore split, padding and slicing path).
    B2 = 300
    kx2, ka2 = jax.random.split(jax.random.PRNGKey(1))
    x2 = jax.random.normal(kx2, (B2, state_dim), dtype=jnp.float32)
    a2 = jax.random.normal(ka2, (B2, action_dim), dtype=jnp.float32)
    out2 = jax.block_until_ready(qvalue_forward(x2, a2, prepped))
    ref2 = qvalue_reference(x2, a2, params)
    assert out2.shape == (B2, 1), out2.shape
    assert jnp.allclose(out2, ref2, atol=1.5e-1, rtol=5e-2)

    print("KERNEL_OK")
</pallas_src>

<mosaic_0001>
module attributes {stable_mosaic.version = 11 : i64} {
  func.func @kernel(%arg0: i32, %arg1: memref<12x128xbf16, #tpu.memory_space<vmem>>, %arg2: memref<32x12xbf16, #tpu.memory_space<vmem>>, %arg3: memref<32x1xf32, #tpu.memory_space<vmem>>, %arg4: memref<32x32xbf16, #tpu.memory_space<vmem>>, %arg5: memref<32x1xf32, #tpu.memory_space<vmem>>, %arg6: memref<1x32xbf16, #tpu.memory_space<vmem>>, %arg7: memref<1x1xf32, #tpu.memory_space<vmem>>, %arg8: memref<1x128xf32, #tpu.memory_space<vmem>>) attributes {dimension_semantics = [#tpu.dimension_semantics<parallel>], iteration_bounds = array<i64: 1>, scalar_prefetch = 0 : i64, scratch_operands = 0 : i64, tpu.core_type = #tpu.core_type<tc>, window_params = [{transform_indices = @transform_0, window_bounds = array<i64: 12, 128>}, {pipeline_mode = #tpu.pipeline_mode<synchronous>, transform_indices = @transform_1, window_bounds = array<i64: 32, 12>}, {pipeline_mode = #tpu.pipeline_mode<synchronous>, transform_indices = @transform_2, window_bounds = array<i64: 32, 1>}, {pipeline_mode = #tpu.pipeline_mode<synchronous>, transform_indices = @transform_3, window_bounds = array<i64: 32, 32>}, {pipeline_mode = #tpu.pipeline_mode<synchronous>, transform_indices = @transform_4, window_bounds = array<i64: 32, 1>}, {pipeline_mode = #tpu.pipeline_mode<synchronous>, transform_indices = @transform_5, window_bounds = array<i64: 1, 32>}, {pipeline_mode = #tpu.pipeline_mode<synchronous>, transform_indices = @transform_6, window_bounds = array<i64: 1, 1>}, {transform_indices = @transform_7, window_bounds = array<i64: 1, 128>}]} {
    %c0 = arith.constant 0 : index
    %c0_0 = arith.constant 0 : index
    %0 = vector.load %arg1[%c0, %c0_0] : memref<12x128xbf16, #tpu.memory_space<vmem>>, vector<12x128xbf16>
    %c0_1 = arith.constant 0 : index
    %c0_2 = arith.constant 0 : index
    %1 = vector.load %arg2[%c0_1, %c0_2] : memref<32x12xbf16, #tpu.memory_space<vmem>>, vector<32x12xbf16>
    %c0_3 = arith.constant 0 : index
    %c0_4 = arith.constant 0 : index
    %2 = vector.load %arg3[%c0_3, %c0_4] : memref<32x1xf32, #tpu.memory_space<vmem>>, vector<32x1xf32>
    %cst = arith.constant dense<0.000000e+00> : vector<32x128xf32>
    %3 = tpu.matmul %1, %0, %cst {dimension_numbers = #tpu.dot_dimension_numbers<[1], [0], [0], [1], [0, 0, 1, 1], [], []>} : vector<32x12xbf16>, vector<12x128xbf16>, vector<32x128xf32> -> vector<32x128xf32>
    %4 = vector.broadcast %2 : vector<32x1xf32> to vector<32x128xf32>
    %5 = arith.addf %3, %4 : vector<32x128xf32>
    %cst_5 = arith.constant 0.000000e+00 : f32
    %6 = vector.broadcast %cst_5 : f32 to vector<32x128xf32>
    %7 = arith.maximumf %5, %6 : vector<32x128xf32>
    %8 = arith.truncf %7 : vector<32x128xf32> to vector<32x128xbf16>
    %c0_6 = arith.constant 0 : index
    %c0_7 = arith.constant 0 : index
    %9 = vector.load %arg4[%c0_6, %c0_7] : memref<32x32xbf16, #tpu.memory_space<vmem>>, vector<32x32xbf16>
    %c0_8 = arith.constant 0 : index
    %c0_9 = arith.constant 0 : index
    %10 = vector.load %arg5[%c0_8, %c0_9] : memref<32x1xf32, #tpu.memory_space<vmem>>, vector<32x1xf32>
    %cst_10 = arith.constant dense<0.000000e+00> : vector<32x128xf32>
    %11 = tpu.matmul %9, %8, %cst_10 {dimension_numbers = #tpu.dot_dimension_numbers<[1], [0], [0], [1], [0, 0, 1, 1], [], []>} : vector<32x32xbf16>, vector<32x128xbf16>, vector<32x128xf32> -> vector<32x128xf32>
    %12 = vector.broadcast %10 : vector<32x1xf32> to vector<32x128xf32>
    %13 = arith.addf %11, %12 : vector<32x128xf32>
    %cst_11 = arith.constant 0.000000e+00 : f32
    %14 = vector.broadcast %cst_11 : f32 to vector<32x128xf32>
    %15 = arith.maximumf %13, %14 : vector<32x128xf32>
    %16 = arith.truncf %15 : vector<32x128xf32> to vector<32x128xbf16>
    %c0_12 = arith.constant 0 : index
    %c0_13 = arith.constant 0 : index
    %17 = vector.load %arg6[%c0_12, %c0_13] : memref<1x32xbf16, #tpu.memory_space<vmem>>, vector<1x32xbf16>
    %c0_14 = arith.constant 0 : index
    %c0_15 = arith.constant 0 : index
    %18 = vector.load %arg7[%c0_14, %c0_15] : memref<1x1xf32, #tpu.memory_space<vmem>>, vector<1x1xf32>
    %cst_16 = arith.constant dense<0.000000e+00> : vector<1x128xf32>
    %19 = tpu.matmul %17, %16, %cst_16 {dimension_numbers = #tpu.dot_dimension_numbers<[1], [0], [0], [1], [0, 0, 1, 1], [], []>} : vector<1x32xbf16>, vector<32x128xbf16>, vector<1x128xf32> -> vector<1x128xf32>
    %20 = vector.broadcast %18 : vector<1x1xf32> to vector<1x128xf32>
    %21 = arith.addf %19, %20 : vector<1x128xf32>
    %c0_17 = arith.constant 0 : index
    %c0_18 = arith.constant 0 : index
    %22 = vector.load %arg8[%c0_17, %c0_18] : memref<1x128xf32, #tpu.memory_space<vmem>>, vector<1x128xf32>
    tpu.vector_store %arg8[%c0_17, %c0_18], %21 {strides = array<i32>} : memref<1x128xf32, #tpu.memory_space<vmem>>, vector<1x128xf32>,
    return
  }
  func.func @transform_0(%arg0: i32) -> (i32, i32) {
    %c0_i32 = arith.constant 0 : i32
    %c0_i32_0 = arith.constant 0 : i32
    return %c0_i32, %arg0 : i32, i32
  }
  func.func @transform_1(%arg0: i32) -> (i32, i32) {
    %c0_i32 = arith.constant 0 : i32
    %c0_i32_0 = arith.constant 0 : i32
    %c0_i32_1 = arith.constant 0 : i32
    return %c0_i32, %c0_i32_0 : i32, i32
  }
  func.func @transform_2(%arg0: i32) -> (i32, i32) {
    %c0_i32 = arith.constant 0 : i32
    %c0_i32_0 = arith.constant 0 : i32
    %c0_i32_1 = arith.constant 0 : i32
    return %c0_i32, %c0_i32_0 : i32, i32
  }
  func.func @transform_3(%arg0: i32) -> (i32, i32) {
    %c0_i32 = arith.constant 0 : i32
    %c0_i32_0 = arith.constant 0 : i32
    %c0_i32_1 = arith.constant 0 : i32
    return %c0_i32, %c0_i32_0 : i32, i32
  }
  func.func @transform_4(%arg0: i32) -> (i32, i32) {
    %c0_i32 = arith.constant 0 : i32
    %c0_i32_0 = arith.constant 0 : i32
    %c0_i32_1 = arith.constant 0 : i32
    return %c0_i32, %c0_i32_0 : i32, i32
  }
  func.func @transform_5(%arg0: i32) -> (i32, i32) {
    %c0_i32 = arith.constant 0 : i32
    %c0_i32_0 = arith.constant 0 : i32
    %c0_i32_1 = arith.constant 0 : i32
    return %c0_i32, %c0_i32_0 : i32, i32
  }
  func.func @transform_6(%arg0: i32) -> (i32, i32) {
    %c0_i32 = arith.constant 0 : i32
    %c0_i32_0 = arith.constant 0 : i32
    %c0_i32_1 = arith.constant 0 : i32
    return %c0_i32, %c0_i32_0 : i32, i32
  }
  func.func @transform_7(%arg0: i32) -> (i32, i32) {
    %c0_i32 = arith.constant 0 : i32
    %c0_i32_0 = arith.constant 0 : i32
    return %c0_i32, %arg0 : i32, i32
  }
}

</mosaic_0001>

<bundles_post_ra>
// kernel: qvalue_forward.1
= control target key start
LH: loop header
LB: loop body
LE: loop exit
PB: predicated region body
PF: predicated region fallthrough
CT: control target
= control target key end

     0   :  { %vm81_vm0 = vcmask 1045504   ;;  %vm74_vm1 = vcmask 97280   ;;  %v352_v1 = vmov 0   ;;  %vm178_vm2 = vcmask 261120   ;;  %s448_s0 = inlined_call_operand.vmem [shape: bf16[12,128], index: 0, kind: input, shape index: {}]   ;;  %s449_s1 = inlined_call_operand.vmem [shape: bf16[32,12], index: 1, kind: input, shape index: {}]   ;;  %s450_s6 = inlined_call_operand.<no memory space> [shape: f32[1,1], index: 6, kind: input, shape index: {}]   ;;  %s451_s2 = inlined_call_operand.vmem [shape: f32[32,1], index: 2, kind: input, shape index: {}]   ;;  %s452_s4 = inlined_call_operand.vmem [shape: f32[32,1], index: 4, kind: input, shape index: {}]   ;;  %s453_s3 = inlined_call_operand.vmem [shape: bf16[32,32], index: 3, kind: input, shape index: {}]   ;;  %s454_s5 = inlined_call_operand.vmem [shape: bf16[1,32], index: 5, kind: input, shape index: {}]   ;;  %s455_s7 = inlined_call_operand.vmem [shape: f32[1,128], index: 7, kind: output, shape index: {}]  }
   0x1   :  { %v347_v0 = vld [vmem:[%s448_s0] sm:$0x3f]   ;;  %345 = vset.pattern.permute.xlu0 %v352_v1  ;;  %346 = vset.pattern.permute.xlu1 %v352_v1  ;;  %v12_v2 = vstv %s450_s6  ;;  %v349_v5 = vld [vmem:[%s449_s1 + $0x8] sm:$0xff]   ;;  %v37_v7 = vld [vmem:[%s451_s2 + $0x10] sm:$0xff]  ;;  %v353_v35 = vmov 0.0   ;;  %vm354_vm3 = vmmov 0   ;;  %v247_v55 = vlaneseq }
   0x2   :  { %v348_v3 = vld [vmem:[%s449_s1] sm:$0xff]   ;;  %13 = vst [vmem:[#allocation2] sm:$0x1] %v12_v2  ;;  %341 = vmatprep.subr.msk.bf16.mxu0 %vm81_vm0, %v347_v0  ;;  %v83_v4 = vsel %vm81_vm0, %v347_v0, 0  ;;  %51 = vperm.xlu1 %346, %v37_v7   ;;  %v36_v8 = vld [vmem:[%s451_s2 + $0x8] sm:$0xff]  ;;  %v38_v9 = vld [vmem:[%s451_s2 + $0x18] sm:$0xff] }
   0x3   :  { %320 = vmatpush3.bf16.msra.mxu0 %v83_v4  ;;  %321 = vmatprep.mubr.msk.bf16.mxu0 %vm74_vm1, %v348_v3  ;;  %v35_v6 = vld [vmem:[%s451_s2] sm:$0xff]  ;;  %v145_v11 = vld [vmem:[%s452_s4 + $0x8] sm:$0xff]  ;;  %v146_v12 = vld [vmem:[%s452_s4 + $0x10] sm:$0xff]  ;;  %v248_v56 = vshrl.u32 %v247_v55, 7 }
   0x4   :  { %41 = vperm.xlu0 %345, %v35_v6   ;;  %v144_v10 = vld [vmem:[%s452_s4] sm:$0xff]  ;;  %v147_v13 = vld [vmem:[%s452_s4 + $0x18] sm:$0xff]  ;;  %v351_v34 = vld [vmem:[%s453_s3 + $0x8] sm:$0xff]   ;;  %333 = vmatprep.subr.bf16.mxu0 %v353_v35 }
   0x5   :  { %v350_v15 = vld [vmem:[%s453_s3] sm:$0xff]   ;;  %v249_v57 = vsub.s32 0, %v248_v56 }
   0x6   :  { %322 = vmatmul.mubr.msk.bf16.vlgmr.msra.gmra.mrb[0].mxu0 %vm74_vm1, %v349_v5  ;;  %56 = vperm.xlu1 %346, %v38_v9   ;;  %v240_v54 = vld [vmem:[%s454_s5] sm:$0x1] }
   0x7   :  { %329 = vmatprep.mubr.msk.bf16.mxu1 %vm178_vm2, %v350_v15  ;;  %337 = vmatprep.mubr.msk.bf16.mxu0 %vm354_vm3, %v353_v35 }
   0x8   :  { %46 = vperm.xlu0 %345, %v36_v8  }
   0x9   :  { %v241_v14 = vld [vmem:[#allocation2] sm:$0x1] }
   0xa   :  { %155 = vperm.xlu1 %346, %v145_v11  }
   0xc   :  { %150 = vperm.xlu0 %345, %v144_v10  }
   0xe   :  { %165 = vperm.xlu1 %346, %v147_v13  }
  0x10   :  { %160 = vperm.xlu0 %345, %v146_v12  }
  0x14   :  { %244 = vperm.xlu0 %345, %v241_v14  }
  0x81   :  { %v52_v16 = vpop.permute.xlu1 %51 }
  0x83   :  { %v42_v17 = vpop.permute.xlu0 %41 }
  0x85   :  { %v57_v21 = vpop.permute.xlu1 %56 }
  0x87   :  { %v47_v24 = vpop.permute.xlu0 %46 }
  0x89   :  { %v156_v37 = vpop.permute.xlu1 %155 }
  0x8b   :  { %v151_v36 = vpop.permute.xlu0 %150 }
  0x8d   :  { %v166_v42 = vpop.permute.xlu1 %165 }
  0x8f   :  { %v161_v38 = vpop.permute.xlu0 %160 }
  0x93   :  { %v245_v58 = vpop.permute.xlu0 %244 }
  0x94   :  { %v250_v59 = vrot.slane %v245_v58, %v249_v57 }
  0xd9   :  { %v323_v18 = vpop.f32.mrb[0].mxu0 }
  0xda   :  { %v128_v19 = vadd.f32 %v323_v18, %v52_v16  ;;  %v119_v20 = vpop.f32.mrb[1].mxu0 }
  0xdb   :  { %v120_v22 = vadd.f32 %v119_v20, %v42_v17  ;;  %v324_v23 = vpop.f32.mrb[2].mxu0 }
  0xdc   :  { %v131_v25 = vadd.f32 %v324_v23, %v57_v21  ;;  %v122_v26 = vpop.f32.mrb[3].mxu0  ;;  %v136_v28 = vmax.f32 %v128_v19, 0.0 }
  0xdd   :  { %v123_v27 = vadd.f32 %v122_v26, %v47_v24  ;;  %v134_v30 = vmax.f32 %v120_v22, 0.0 }
  0xde   :  { %v137_v29 = vmax.f32 %v131_v25, 0.0 }
  0xdf   :  { %v135_v31 = vmax.f32 %v123_v27, 0.0 }
  0xe0   :  { %v139_v32 = vpack.c.bf16 %v137_v29, %v136_v28 }
  0xe1   :  { %v138_v33 = vpack.c.bf16 %v135_v31, %v134_v30 }
  0xe3   :  { %325 = vmatprep.subr.bf16.mxu1 %v138_v33 }
  0xe4   :  { %326 = vmatpush3.bf16.msra.mxu1 %v138_v33 }
  0xe5   :  { %327 = vmatprep.subr.bf16.mxu1 %v139_v32 }
  0xe8   :  { %328 = vmatpush3.bf16.msra.mxu1 %v139_v32 }
  0xeb   :  { %330 = vmatmul.mubr.msk.bf16.vlgmr.msra.gmra.mrb[0].mxu1 %vm178_vm2, %v351_v34 }
 0x1be   :  { %v331_v39 = vpop.f32.mrb[0].mxu1 }
 0x1bf   :  { %v228_v40 = vadd.f32 %v331_v39, %v161_v38  ;;  %v219_v41 = vpop.f32.mrb[1].mxu1 }
 0x1c0   :  { %v220_v43 = vadd.f32 %v219_v41, %v151_v36  ;;  %v332_v44 = vpop.f32.mrb[2].mxu1 }
 0x1c1   :  { %v231_v45 = vadd.f32 %v332_v44, %v166_v42  ;;  %v222_v46 = vpop.f32.mrb[3].mxu1  ;;  %v236_v48 = vmax.f32 %v228_v40, 0.0 }
 0x1c2   :  { %v223_v47 = vadd.f32 %v222_v46, %v156_v37  ;;  %v234_v50 = vmax.f32 %v220_v43, 0.0 }
 0x1c3   :  { %v237_v49 = vmax.f32 %v231_v45, 0.0 }
 0x1c4   :  { %v235_v51 = vmax.f32 %v223_v47, 0.0 }
 0x1c5   :  { %v239_v52 = vpack.c.bf16 %v237_v49, %v236_v48 }
 0x1c6   :  { %v238_v53 = vpack.c.bf16 %v235_v51, %v234_v50 }
 0x1c8   :  { %334 = vmatpush3.bf16.msra.mxu0 %v238_v53 }
 0x1c9   :  { %335 = vmatprep.subr.bf16.mxu0 %v353_v35 }
 0x1cc   :  { %336 = vmatpush3.bf16.msra.mxu0 %v239_v52 }
 0x1cf   :  { %338 = vmatmul.mubr.msk.bf16.vlgmr.msra.gmra.mrb[4].mxu0 %vm178_vm2, %v240_v54 }
 0x2a2   :  { %v288_v60 = vpop.f32.mrb[4].mxu0 }
 0x2a3   :  { %v289_v61 = vadd.f32 %v288_v60, %v250_v59  ;;  %v339_v62 = vpop.f32.mrb[5].mxu0 }
 0x2a4   :  { %v291_v63 = vpop.f32.mrb[6].mxu0 }
 0x2a5   :  { %294 = vst [vmem:[%s455_s7] sm:$0x1] %v289_v61  ;;  %v340_v0 = vpop.f32.mrb[7].mxu0 }

</bundles_post_ra>
